<compile_context>
chip_gen: v7x
topology: tpu7x:2x2x1
jax: 0.10.0
libtpu: 0.0.40
codegen_flags: <defaults>
</compile_context>

<pallas_src>
import jax
import jax.numpy as jnp
from jax.experimental import pallas as pl
from jax.experimental.pallas import tpu as pltpu


def mlp_kernel(x_ref, w1_ref, b1_ref, w2_ref, b2_ref, w3_ref, b3_ref,
               w4t_ref, b4_ref, o_ref):
    # Layer 1: (tile_b, D) @ (D, 128) + bias, ReLU   -- all f32, MXU matmul.
    h = jnp.dot(x_ref[...], w1_ref[...], preferred_element_type=jnp.float32)
    h = jnp.maximum(h + b1_ref[...], 0.0)
    # Layer 2: (tile_b, 128) @ (128, 64)
    h = jnp.dot(h, w2_ref[...], preferred_element_type=jnp.float32)
    h = jnp.maximum(h + b2_ref[...], 0.0)
    # Layer 3: (tile_b, 64) @ (64, 32)
    h = jnp.dot(h, w3_ref[...], preferred_element_type=jnp.float32)
    h = jnp.maximum(h + b3_ref[...], 0.0)
    # Layer 4 (32 -> 1): VPU broadcast multiply + cross-lane sum (XLU reduce);
    # w4t_ref is the transposed weight (1, 32). Result is a narrow column.
    out = jnp.sum(h * w4t_ref[...], axis=-1, keepdims=True) + b4_ref[...]
    o_ref[...] = out.astype(o_ref.dtype)


def _round_up(n, m):
    return ((n + m - 1) // m) * m


def my_reg_forward(x, params, *, max_tile_b=2048):
    """x: (B, input_dim) float32. params: dict w1,b1,...,w4,b4. Returns (B, 1)."""
    B, D = x.shape
    w1, b1 = params["w1"], params["b1"]            # (D, 128), (1, 128)
    w2, b2 = params["w2"], params["b2"]            # (128, 64), (1, 64)
    w3, b3 = params["w3"], params["b3"]            # (64, 32),  (1, 32)
    w4t = jnp.transpose(params["w4"])              # (32, 1) -> (1, 32)
    b4 = params["b4"]                              # (1, 1)

    # Tile selection: decide the number of tiles first (>= 2 when the batch
    # allows it, so both v7x TensorCores get work on the "parallel" axis and
    # large batches are not split into thousands of tiny grid steps), then
    # size the tile to it.  Padding waste is at most 8 rows per tile.
    B8 = _round_up(B, 8)
    n_tiles = max(pl.cdiv(B8, max_tile_b), 2 if B8 >= 16 else 1)
    tile_b = _round_up(pl.cdiv(B8, n_tiles), 8)
    Bp = tile_b * n_tiles
    if Bp != B:
        x = jnp.pad(x, ((0, Bp - B), (0, 0)))      # small tail pad only

    grid = (n_tiles,)

    def resident(shape):
        # weights/biases: one full block, kept VMEM-resident across all tiles
        return pl.BlockSpec(shape, lambda i: (0, 0))

    flops = 2 * Bp * (D * 128 + 128 * 64 + 64 * 32 + 32 * 1)
    param_bytes = sum(int(a.size) * a.dtype.itemsize
                      for a in (w1, b1, w2, b2, w3, b3, w4t, b4))
    bytes_accessed = Bp * D * 4 + param_bytes + Bp * 1 * 4

    out = pl.pallas_call(
        mlp_kernel,
        out_shape=jax.ShapeDtypeStruct((Bp, 1), jnp.float32),
        grid_spec=pltpu.PrefetchScalarGridSpec(
            num_scalar_prefetch=0,
            grid=grid,
            in_specs=[
                pl.BlockSpec((tile_b, D), lambda i: (i, 0)),   # x batch tile
                resident(w1.shape), resident(b1.shape),
                resident(w2.shape), resident(b2.shape),
                resident(w3.shape), resident(b3.shape),
                resident(w4t.shape), resident(b4.shape),
            ],
            out_specs=pl.BlockSpec((tile_b, 1), lambda i: (i, 0)),
        ),
        compiler_params=pltpu.CompilerParams(
            dimension_semantics=("parallel",)),
        cost_estimate=pl.CostEstimate(
            flops=flops, transcendentals=0, bytes_accessed=bytes_accessed),
    )(x, w1, b1, w2, b2, w3, b3, w4t, b4)

    return out[:B] if Bp != B else out


def init_params(key, input_dim):
    """Deterministic init matching nn.Linear shapes (stored transposed)."""
    dims = [(input_dim, 128), (128, 64), (64, 32), (32, 1)]
    params = {}
    for idx, (fan_in, fan_out) in enumerate(dims, start=1):
        key, kw, kb = jax.random.split(key, 3)
        bound = 1.0 / jnp.sqrt(fan_in)
        params[f"w{idx}"] = jax.random.uniform(
            kw, (fan_in, fan_out), jnp.float32, -bound, bound)
        # biases kept 2D (1, fan_out); broadcast over batch inside the kernel
        params[f"b{idx}"] = jax.random.uniform(
            kb, (1, fan_out), jnp.float32, -bound, bound)
    return params


if __name__ == "__main__":
    key = jax.random.PRNGKey(0)
    input_dim = 32
    batch = 256

    kx, kp = jax.random.split(key)
    x = jax.random.normal(kx, (batch, input_dim), jnp.float32)
    params = init_params(kp, input_dim)

    y = my_reg_forward(x, params)
    y = jax.block_until_ready(y)
    assert y.shape == (batch, 1), y.shape

    # Full-precision f32 reference (the PyTorch module's exact math).
    def ref_f32(x, p):
        h = jnp.maximum(x @ p["w1"] + p["b1"], 0.0)
        h = jnp.maximum(h @ p["w2"] + p["b2"], 0.0)
        h = jnp.maximum(h @ p["w3"] + p["b3"], 0.0)
        return h @ p["w4"] + p["b4"]

    y_ref = ref_f32(x, params)
    err = float(jnp.max(jnp.abs(y - y_ref)))
    assert jnp.allclose(y, y_ref, atol=2e-2, rtol=2e-2), err

    # Ragged / odd batch size exercises the tail-padding + slice path.
    x_odd = jax.random.normal(kx, (37, input_dim), jnp.float32)
    y_odd = jax.block_until_ready(my_reg_forward(x_odd, params))
    assert y_odd.shape == (37, 1)
    assert jnp.allclose(y_odd, ref_f32(x_odd, params), atol=2e-2, rtol=2e-2)

    print("KERNEL_OK")
</pallas_src>

<mosaic_0001>
module attributes {stable_mosaic.version = 11 : i64} {
  func.func @mlp_kernel(%arg0: i32, %arg1: memref<128x32xf32, #tpu.memory_space<vmem>>, %arg2: memref<32x128xf32, #tpu.memory_space<vmem>>, %arg3: memref<1x128xf32, #tpu.memory_space<vmem>>, %arg4: memref<128x64xf32, #tpu.memory_space<vmem>>, %arg5: memref<1x64xf32, #tpu.memory_space<vmem>>, %arg6: memref<64x32xf32, #tpu.memory_space<vmem>>, %arg7: memref<1x32xf32, #tpu.memory_space<vmem>>, %arg8: memref<1x32xf32, #tpu.memory_space<vmem>>, %arg9: memref<1x1xf32, #tpu.memory_space<vmem>>, %arg10: memref<128x1xf32, #tpu.memory_space<vmem>>) attributes {dimension_semantics = [#tpu.dimension_semantics<parallel>], iteration_bounds = array<i64: 2>, scalar_prefetch = 0 : i64, scratch_operands = 0 : i64, tpu.core_type = #tpu.core_type<tc>, window_params = [{transform_indices = @transform_0, window_bounds = array<i64: 128, 32>}, {pipeline_mode = #tpu.pipeline_mode<synchronous>, transform_indices = @transform_1, window_bounds = array<i64: 32, 128>}, {pipeline_mode = #tpu.pipeline_mode<synchronous>, transform_indices = @transform_2, window_bounds = array<i64: 1, 128>}, {pipeline_mode = #tpu.pipeline_mode<synchronous>, transform_indices = @transform_3, window_bounds = array<i64: 128, 64>}, {pipeline_mode = #tpu.pipeline_mode<synchronous>, transform_indices = @transform_4, window_bounds = array<i64: 1, 64>}, {pipeline_mode = #tpu.pipeline_mode<synchronous>, transform_indices = @transform_5, window_bounds = array<i64: 64, 32>}, {pipeline_mode = #tpu.pipeline_mode<synchronous>, transform_indices = @transform_6, window_bounds = array<i64: 1, 32>}, {pipeline_mode = #tpu.pipeline_mode<synchronous>, transform_indices = @transform_7, window_bounds = array<i64: 1, 32>}, {pipeline_mode = #tpu.pipeline_mode<synchronous>, transform_indices = @transform_8, window_bounds = array<i64: 1, 1>}, {transform_indices = @transform_9, window_bounds = array<i64: 128, 1>}]} {
    %c0 = arith.constant 0 : index
    %c0_0 = arith.constant 0 : index
    %0 = vector.load %arg1[%c0, %c0_0] : memref<128x32xf32, #tpu.memory_space<vmem>>, vector<128x32xf32>
    %c0_1 = arith.constant 0 : index
    %c0_2 = arith.constant 0 : index
    %1 = vector.load %arg2[%c0_1, %c0_2] : memref<32x128xf32, #tpu.memory_space<vmem>>, vector<32x128xf32>
    %cst = arith.constant dense<0.000000e+00> : vector<128x128xf32>
    %2 = tpu.matmul %0, %1, %cst {dimension_numbers = #tpu.dot_dimension_numbers<[1], [0], [0], [1], [0, 0, 1, 1], [], []>} : vector<128x32xf32>, vector<32x128xf32>, vector<128x128xf32> -> vector<128x128xf32>
    %c0_3 = arith.constant 0 : index
    %c0_4 = arith.constant 0 : index
    %3 = vector.load %arg3[%c0_3, %c0_4] : memref<1x128xf32, #tpu.memory_space<vmem>>, vector<1x128xf32>
    %4 = vector.broadcast %3 : vector<1x128xf32> to vector<128x128xf32>
    %5 = arith.addf %2, %4 : vector<128x128xf32>
    %cst_5 = arith.constant 0.000000e+00 : f32
    %6 = vector.broadcast %cst_5 : f32 to vector<128x128xf32>
    %7 = arith.maximumf %5, %6 : vector<128x128xf32>
    %c0_6 = arith.constant 0 : index
    %c0_7 = arith.constant 0 : index
    %8 = vector.load %arg4[%c0_6, %c0_7] : memref<128x64xf32, #tpu.memory_space<vmem>>, vector<128x64xf32>
    %cst_8 = arith.constant dense<0.000000e+00> : vector<128x64xf32>
    %9 = tpu.matmul %7, %8, %cst_8 {dimension_numbers = #tpu.dot_dimension_numbers<[1], [0], [0], [1], [0, 0, 1, 1], [], []>} : vector<128x128xf32>, vector<128x64xf32>, vector<128x64xf32> -> vector<128x64xf32>
    %c0_9 = arith.constant 0 : index
    %c0_10 = arith.constant 0 : index
    %10 = vector.load %arg5[%c0_9, %c0_10] : memref<1x64xf32, #tpu.memory_space<vmem>>, vector<1x64xf32>
    %11 = vector.broadcast %10 : vector<1x64xf32> to vector<128x64xf32>
    %12 = arith.addf %9, %11 : vector<128x64xf32>
    %cst_11 = arith.constant 0.000000e+00 : f32
    %13 = vector.broadcast %cst_11 : f32 to vector<128x64xf32>
    %14 = arith.maximumf %12, %13 : vector<128x64xf32>
    %c0_12 = arith.constant 0 : index
    %c0_13 = arith.constant 0 : index
    %15 = vector.load %arg6[%c0_12, %c0_13] : memref<64x32xf32, #tpu.memory_space<vmem>>, vector<64x32xf32>
    %cst_14 = arith.constant dense<0.000000e+00> : vector<128x32xf32>
    %16 = tpu.matmul %14, %15, %cst_14 {dimension_numbers = #tpu.dot_dimension_numbers<[1], [0], [0], [1], [0, 0, 1, 1], [], []>} : vector<128x64xf32>, vector<64x32xf32>, vector<128x32xf32> -> vector<128x32xf32>
    %c0_15 = arith.constant 0 : index
    %c0_16 = arith.constant 0 : index
    %17 = vector.load %arg7[%c0_15, %c0_16] : memref<1x32xf32, #tpu.memory_space<vmem>>, vector<1x32xf32>
    %18 = vector.broadcast %17 : vector<1x32xf32> to vector<128x32xf32>
    %19 = arith.addf %16, %18 : vector<128x32xf32>
    %cst_17 = arith.constant 0.000000e+00 : f32
    %20 = vector.broadcast %cst_17 : f32 to vector<128x32xf32>
    %21 = arith.maximumf %19, %20 : vector<128x32xf32>
    %c0_18 = arith.constant 0 : index
    %c0_19 = arith.constant 0 : index
    %22 = vector.load %arg8[%c0_18, %c0_19] : memref<1x32xf32, #tpu.memory_space<vmem>>, vector<1x32xf32>
    %23 = vector.broadcast %22 : vector<1x32xf32> to vector<128x32xf32>
    %24 = arith.mulf %21, %23 : vector<128x32xf32>
    %cst_20 = arith.constant dense<0.000000e+00> : vector<128xf32>
    %25 = vector.multi_reduction <add>, %24, %cst_20 [1] : vector<128x32xf32> to vector<128xf32>
    %26 = vector.shape_cast %25 : vector<128xf32> to vector<128x1xf32>
    %c0_21 = arith.constant 0 : index
    %c0_22 = arith.constant 0 : index
    %27 = vector.load %arg9[%c0_21, %c0_22] : memref<1x1xf32, #tpu.memory_space<vmem>>, vector<1x1xf32>
    %28 = vector.broadcast %27 : vector<1x1xf32> to vector<128x1xf32>
    %29 = arith.addf %26, %28 : vector<128x1xf32>
    %c0_23 = arith.constant 0 : index
    %c0_24 = arith.constant 0 : index
    %30 = vector.load %arg10[%c0_23, %c0_24] : memref<128x1xf32, #tpu.memory_space<vmem>>, vector<128x1xf32>
    tpu.vector_store %arg10[%c0_23, %c0_24], %29 {strides = array<i32>} : memref<128x1xf32, #tpu.memory_space<vmem>>, vector<128x1xf32>,
    return
  }
  func.func @transform_0(%arg0: i32) -> (i32, i32) {
    %c0_i32 = arith.constant 0 : i32
    %c0_i32_0 = arith.constant 0 : i32
    return %arg0, %c0_i32 : i32, i32
  }
  func.func @transform_1(%arg0: i32) -> (i32, i32) {
    %c0_i32 = arith.constant 0 : i32
    %c0_i32_0 = arith.constant 0 : i32
    %c0_i32_1 = arith.constant 0 : i32
    return %c0_i32, %c0_i32_0 : i32, i32
  }
  func.func @transform_2(%arg0: i32) -> (i32, i32) {
    %c0_i32 = arith.constant 0 : i32
    %c0_i32_0 = arith.constant 0 : i32
    %c0_i32_1 = arith.constant 0 : i32
    return %c0_i32, %c0_i32_0 : i32, i32
  }
  func.func @transform_3(%arg0: i32) -> (i32, i32) {
    %c0_i32 = arith.constant 0 : i32
    %c0_i32_0 = arith.constant 0 : i32
    %c0_i32_1 = arith.constant 0 : i32
    return %c0_i32, %c0_i32_0 : i32, i32
  }
  func.func @transform_4(%arg0: i32) -> (i32, i32) {
    %c0_i32 = arith.constant 0 : i32
    %c0_i32_0 = arith.constant 0 : i32
    %c0_i32_1 = arith.constant 0 : i32
    return %c0_i32, %c0_i32_0 : i32, i32
  }
  func.func @transform_5(%arg0: i32) -> (i32, i32) {
    %c0_i32 = arith.constant 0 : i32
    %c0_i32_0 = arith.constant 0 : i32
    %c0_i32_1 = arith.constant 0 : i32
    return %c0_i32, %c0_i32_0 : i32, i32
  }
  func.func @transform_6(%arg0: i32) -> (i32, i32) {
    %c0_i32 = arith.constant 0 : i32
    %c0_i32_0 = arith.constant 0 : i32
    %c0_i32_1 = arith.constant 0 : i32
    return %c0_i32, %c0_i32_0 : i32, i32
  }
  func.func @transform_7(%arg0: i32) -> (i32, i32) {
    %c0_i32 = arith.constant 0 : i32
    %c0_i32_0 = arith.constant 0 : i32
    %c0_i32_1 = arith.constant 0 : i32
    return %c0_i32, %c0_i32_0 : i32, i32
  }
  func.func @transform_8(%arg0: i32) -> (i32, i32) {
    %c0_i32 = arith.constant 0 : i32
    %c0_i32_0 = arith.constant 0 : i32
    %c0_i32_1 = arith.constant 0 : i32
    return %c0_i32, %c0_i32_0 : i32, i32
  }
  func.func @transform_9(%arg0: i32) -> (i32, i32) {
    %c0_i32 = arith.constant 0 : i32
    %c0_i32_0 = arith.constant 0 : i32
    return %arg0, %c0_i32 : i32, i32
  }
}

</mosaic_0001>

<bundles_post_ra>
// kernel: tpu_custom_call.1
= control target key start
LH: loop header
LB: loop body
LE: loop exit
PB: predicated region body
PF: predicated region fallthrough
CT: control target
= control target key end

     0   :  { %s1536_s11 = smov 0   ;;  %s1810_s0 = inlined_call_operand.vmem [shape: f32[256,32], index: 0, kind: input, shape index: {}]   ;;  %s1811_s1 = inlined_call_operand.vmem [shape: f32[32,128], index: 1, kind: input, shape index: {}]   ;;  %s1812_s2 = inlined_call_operand.vmem [shape: f32[1,128], index: 2, kind: input, shape index: {}]   ;;  %s1813_s3 = inlined_call_operand.vmem [shape: f32[128,64], index: 3, kind: input, shape index: {}]   ;;  %s1814_s4 = inlined_call_operand.vmem [shape: f32[1,64], index: 4, kind: input, shape index: {}]   ;;  %s1815_s5 = inlined_call_operand.vmem [shape: f32[64,32], index: 5, kind: input, shape index: {}]   ;;  %s1816_s6 = inlined_call_operand.vmem [shape: f32[1,32], index: 6, kind: input, shape index: {}]   ;;  %s1817_s7 = inlined_call_operand.vmem [shape: f32[1,32], index: 7, kind: input, shape index: {}]   ;;  %s1818_s8 = inlined_call_operand.<no memory space> [shape: f32[1,1], index: 8, kind: input, shape index: {}]   ;;  %s1819_s9 = inlined_call_operand.vmem [shape: f32[256,1], index: 9, kind: output, shape index: {}]  }
   0x1   :  { %v14_v0 = vstv %s1818_s8 }
   0x2   :  { %15 = vst [vmem:[#allocation2] sm:$0x1] %v14_v0 }
   0x3 LB: > { %s1151_s12 = sadd.s32 4294967295, %s1481_s11   ;;  %p1155_p0 = scmp.ge.s32.totalorder %s1481_s11, 1  ;;  %s1481_s11 = sphi %s1536_s11, %s21_s11  }
   0x4   : > { %p290_p1 = scmp.lt.s32.totalorder %s1481_s11, 3 }
   0x6   : > { %p291_p2 = pnand %p1155_p0, %p290_p1 }
   0x7   : > { %v354_v1 = vld [vmem:[%s1811_s1] sm:$0xff] (!%p291_p2)  ;;  %v355_v2 = vld [vmem:[%s1811_s1 + $0x8] sm:$0xff] (!%p291_p2)  ;;  %v356_v3 = vld [vmem:[%s1811_s1 + $0x10] sm:$0xff] (!%p291_p2)  ;;  %s1156_s18 = sshll.u32 (!%p291_p2), %s1151_s12, 4  ;;  %vm365_vm0 = vcmask (!%p291_p2), 261120   ;;  %vm774_vm1 = vcmask (!%p291_p2), 523264  }
   0x8   : > { %294 = sbr.rel (%p291_p2) target bundleno = 852 (0x354), region = 56  ;;  %v1403_v4 = vpack.c.bf16 (!%p291_p2), %v355_v2, %v354_v1  ;;  %v357_v5 = vld [vmem:[%s1811_s1 + $0x18] sm:$0xff] (!%p291_p2)  ;;  %p327_p3 = scmp.lt.s32.totalorder (!%p291_p2), %s1156_s18, 31  ;;  %v575_v6 = vld [vmem:[%s1813_s3] sm:$0xff] (!%p291_p2)  ;;  %v576_v7 = vld [vmem:[%s1813_s3 + $0x8] sm:$0xff] (!%p291_p2)  ;;  %vm1078_vm2 = vcmask (!%p291_p2), 7168  }
   0x9   : > { %v1407_v8 = vpack.c.bf16 (!%p291_p2), %v357_v5, %v356_v3  ;;  %v1411_v9 = vpack.c.bf16 (!%p291_p2), %v576_v7, %v575_v6  ;;  %v577_v10 = vld [vmem:[%s1813_s3 + $0x10] sm:$0xff] (!%p291_p2)  ;;  %v578_v11 = vld [vmem:[%s1813_s3 + $0x18] sm:$0xff] (!%p291_p2)  ;;  %v579_v13 = vld [vmem:[%s1813_s3 + $0x20] sm:$0xff] (!%p291_p2) }
   0xa   : > { %1404 = vmatprep.subr.bf16.mxu0 (!%p291_p2), %v1403_v4  ;;  %v1415_v12 = vpack.c.bf16 (!%p291_p2), %v578_v11, %v577_v10  ;;  %v580_v14 = vld [vmem:[%s1813_s3 + $0x28] sm:$0xff] (!%p291_p2)  ;;  %v581_v17 = vld [vmem:[%s1813_s3 + $0x30] sm:$0xff] (!%p291_p2)  ;;  %v582_v18 = vld [vmem:[%s1813_s3 + $0x38] sm:$0xff] (!%p291_p2) }
   0xb   : > { %1406 = vmatpush3.bf16.msra.mxu0 (!%p291_p2), %v1403_v4  ;;  %1412 = vmatprep.subr.bf16.mxu1 (!%p291_p2), %v1411_v9  ;;  %v1419_v15 = vpack.c.bf16 (!%p291_p2), %v580_v14, %v579_v13  ;;  %v1423_v21 = vpack.c.bf16 (!%p291_p2), %v582_v18, %v581_v17  ;;  %v583_v22 = vld [vmem:[%s1813_s3 + $0x40] sm:$0xff] (!%p291_p2)  ;;  %v584_v23 = vld [vmem:[%s1813_s3 + $0x48] sm:$0xff] (!%p291_p2)  ;;  %v585_v27 = vld [vmem:[%s1813_s3 + $0x50] sm:$0xff] (!%p291_p2) }
   0xc   : > { %1408 = vmatprep.subr.bf16.mxu0 (!%p291_p2), %v1407_v8  ;;  %1414 = vmatpush3.bf16.msra.mxu1 (!%p291_p2), %v1411_v9  ;;  %v1427_v26 = vpack.c.bf16 (!%p291_p2), %v584_v23, %v583_v22  ;;  %v586_v28 = vld [vmem:[%s1813_s3 + $0x58] sm:$0xff] (!%p291_p2)  ;;  %v587_v32 = vld [vmem:[%s1813_s3 + $0x60] sm:$0xff] (!%p291_p2)  ;;  %v588_v33 = vld [vmem:[%s1813_s3 + $0x68] sm:$0xff] (!%p291_p2) }
   0xd   : > { %1416 = vmatprep.subr.bf16.mxu1 (!%p291_p2), %v1415_v12  ;;  %v1431_v31 = vpack.c.bf16 (!%p291_p2), %v586_v28, %v585_v27  ;;  %v1435_v36 = vpack.c.bf16 (!%p291_p2), %v588_v33, %v587_v32  ;;  %v589_v44 = vld [vmem:[%s1813_s3 + $0x70] sm:$0xff] (!%p291_p2)  ;;  %v590_v45 = vld [vmem:[%s1813_s3 + $0x78] sm:$0xff] (!%p291_p2)  ;;  %v759_v47 = vld [vmem:[%s1815_s5] sm:$0xff] (!%p291_p2) }
   0xe   : > { %v1439_v46 = vpack.c.bf16 (!%p291_p2), %v590_v45, %v589_v44  ;;  %v760_v48 = vld [vmem:[%s1815_s5 + $0x8] sm:$0xff] (!%p291_p2)  ;;  %v761_v49 = vld [vmem:[%s1815_s5 + $0x10] sm:$0xff] (!%p291_p2)  ;;  %v762_v51 = vld [vmem:[%s1815_s5 + $0x18] sm:$0xff] (!%p291_p2) }
   0xf   : > { %s1821_s18 = smov (!%p327_p3, %s1156_s18), 31  ;;  %1410 = vmatpush3.bf16.msra.mxu0 %v1407_v8  ;;  %v1443_v50 = vpack.c.bf16 %v760_v48, %v759_v47  ;;  %v1447_v52 = vpack.c.bf16 %v762_v51, %v761_v49  ;;  %v763_v53 = vld [vmem:[%s1815_s5 + $0x20] sm:$0xff]  ;;  %v764_v54 = vld [vmem:[%s1815_s5 + $0x28] sm:$0xff]  ;;  %v765_v56 = vld [vmem:[%s1815_s5 + $0x30] sm:$0xff] }
  0x10   : > { %s1157_s13 = sshll.u32 %s1821_s18, 3  ;;  %1418 = vmatpush3.bf16.msra.mxu1 %v1415_v12  ;;  %v1451_v55 = vpack.c.bf16 %v764_v54, %v763_v53  ;;  %v766_v57 = vld [vmem:[%s1815_s5 + $0x38] sm:$0xff]  ;;  %v1673_v59 = vld [vmem:[%s1812_s2] ss:$0 sm:$0xff] }
  0x11   : > { %s1582_s15 = scalar_lea.vmem %s1810_s0, %s1157_s13  ;;  %1420 = vmatprep.subr.bf16.mxu1 %v1419_v15  ;;  %1444 = vmatprep.subr.bf16.mxu0 %v1443_v50  ;;  %v1455_v58 = vpack.c.bf16 %v766_v57, %v765_v56  ;;  %v1177_v44 = vld [vmem:[%s1814_s4] ss:$0 sm:$0xff]  ;;  %s1773_s25 = scalar_lea.vmem %s1819_s9, %s1157_s13 }
  0x12   : > { %v338_v16 = vld [vmem:[%s1582_s15] sm:$0xff]  ;;  %v339_v19 = vld [vmem:[%s1582_s15 + $0x8] sm:$0xff]  ;;  %v340_v20 = vld [vmem:[%s1582_s15 + $0x10] sm:$0xff] }
  0x13   : > { %1283 = vmatprep.mubr.msk.f32.mxu0 %vm365_vm0, %v338_v16  ;;  %v341_v24 = vld [vmem:[%s1582_s15 + $0x18] sm:$0xff]  ;;  %v342_v25 = vld [vmem:[%s1582_s15 + $0x20] sm:$0xff]  ;;  %v343_v29 = vld [vmem:[%s1582_s15 + $0x28] sm:$0xff] }
  0x14   : > { %1284 = vmatmul.mubr.msk.f32.vlgmr.msra.gmra.mrb[0].mxu0 %vm365_vm0, %v339_v19  ;;  %1422 = vmatpush3.bf16.msra.mxu1 %v1419_v15  ;;  %v344_v30 = vld [vmem:[%s1582_s15 + $0x30] sm:$0xff]  ;;  %v345_v34 = vld [vmem:[%s1582_s15 + $0x38] sm:$0xff]  ;;  %v346_v35 = vld [vmem:[%s1582_s15 + $0x40] sm:$0xff] }
  0x15   : > { %1286 = vmatprep.mubr.msk.f32.mxu0 %vm365_vm0, %v340_v20  ;;  %1424 = vmatprep.subr.bf16.mxu1 %v1423_v21  ;;  %v347_v37 = vld [vmem:[%s1582_s15 + $0x48] sm:$0xff]  ;;  %v348_v38 = vld [vmem:[%s1582_s15 + $0x50] sm:$0xff]  ;;  %v349_v39 = vld [vmem:[%s1582_s15 + $0x58] sm:$0xff] }
  0x16   : > { %v350_v40 = vld [vmem:[%s1582_s15 + $0x60] sm:$0xff]  ;;  %v351_v41 = vld [vmem:[%s1582_s15 + $0x68] sm:$0xff]  ;;  %v352_v42 = vld [vmem:[%s1582_s15 + $0x70] sm:$0xff]  ;;  %1446 = vmatpush3.bf16.msra.mxu0 %v1443_v50 }
  0x17   : > { %v353_v43 = vld [vmem:[%s1582_s15 + $0x78] sm:$0xff]  ;;  %1448 = vmatprep.subr.bf16.mxu0 %v1447_v52 }
  0x18   : > { %1287 = vmatmul.mubr.msk.f32.gmra.mrb[2].mxu0 %vm365_vm0, %v341_v24  ;;  %1426 = vmatpush3.bf16.msra.mxu1 %v1423_v21 }
  0x19   : > { %1289 = vmatprep.mubr.msk.f32.mxu0 %vm365_vm0, %v342_v25  ;;  %1428 = vmatprep.subr.bf16.mxu1 %v1427_v26 }
  0x1a   : > { %1450 = vmatpush3.bf16.msra.mxu0 %v1447_v52 }
  0x1b   : > { %1452 = vmatprep.subr.bf16.mxu0 %v1451_v55 }
  0x1c   : > { %1290 = vmatmul.mubr.msk.f32.gmra.mrb[4].mxu0 %vm365_vm0, %v343_v29  ;;  %1430 = vmatpush3.bf16.msra.mxu1 %v1427_v26 }
  0x1d   : > { %1292 = vmatprep.mubr.msk.f32.mxu0 %vm365_vm0, %v344_v30  ;;  %1432 = vmatprep.subr.bf16.mxu1 %v1431_v31 }
  0x1e   : > { %1454 = vmatpush3.bf16.msra.mxu0 %v1451_v55 }
  0x1f   : > { %1456 = vmatprep.subr.bf16.mxu0 %v1455_v58 }
  0x20   : > { %1293 = vmatmul.mubr.msk.f32.gmra.mrb[6].mxu0 %vm365_vm0, %v345_v34  ;;  %1434 = vmatpush3.bf16.msra.mxu1 %v1431_v31 }
  0x21   : > { %1295 = vmatprep.mubr.msk.f32.mxu0 %vm365_vm0, %v346_v35  ;;  %1436 = vmatprep.subr.bf16.mxu1 %v1435_v36 }
  0x22   : > { %1458 = vmatpush3.bf16.msra.mxu0 %v1455_v58 }
  0x24   : > { %1296 = vmatmul.mubr.msk.f32.gmra.mrb[8].mxu0 %vm365_vm0, %v347_v37  ;;  %1438 = vmatpush3.bf16.msra.mxu1 %v1435_v36 }
  0x25   : > { %1298 = vmatprep.mubr.msk.f32.mxu0 %vm365_vm0, %v348_v38  ;;  %1440 = vmatprep.subr.bf16.mxu1 %v1439_v46 }
  0x28   : > { %1299 = vmatmul.mubr.msk.f32.gmra.mrb[10].mxu0 %vm365_vm0, %v349_v39  ;;  %1442 = vmatpush3.bf16.msra.mxu1 %v1439_v46 }
  0x29   : > { %1301 = vmatprep.mubr.msk.f32.mxu0 %vm365_vm0, %v350_v40  ;;  %1459 = vmatprep.subr.bf16.mxu1 %v1443_v50 }
  0x2c   : > { %1302 = vmatmul.mubr.msk.f32.gmra.mrb[12].mxu0 %vm365_vm0, %v351_v41 }
  0x2d   : > { %1304 = vmatprep.mubr.msk.f32.mxu0 %vm365_vm0, %v352_v42 }
  0x30   : > { %1305 = vmatmul.mubr.msk.f32.gmra.mrb[14].mxu0 %vm365_vm0, %v353_v43 }
  0xe7   : > { %v1285_v60 = vpop.f32.mrb[0].mxu0 }
  0xe8   : > { %v486_v61 = vadd.f32 %v1285_v60, %v1673_v59  ;;  %v480_v62 = vpop.f32.mrb[1].mxu0 }
  0xe9   : > { %v481_v63 = vadd.f32 %v1673_v59, %v480_v62 }
  0xea   : > { %v560_v2 = vmax.f32 %v486_v61, 0.0 }
  0xeb   : > { %v1288_v0 = vpop.f32.mrb[2].mxu0  ;;  %v559_v1 = vmax.f32 %v481_v63, 0.0 }
  0xec   : > { %v496_v3 = vadd.f32 %v1288_v0, %v1673_v59  ;;  %v490_v4 = vpop.f32.mrb[3].mxu0 }
  0xed   : > { %v491_v5 = vadd.f32 %v1673_v59, %v490_v4  ;;  %1339 = vmatprep.mubr.f32.mxu1 %v559_v1 }
  0xee   : > { %1340 = vmatmul.mubr.f32.vlgmr.msra.gmra.mrb[0].mxu1 %v560_v2  ;;  %v562_v8 = vmax.f32 %v496_v3, 0.0 }
  0xef   : > { %v561_v6 = vmax.f32 %v491_v5, 0.0  ;;  %v1291_v7 = vpop.f32.mrb[4].mxu0  ;;  %1463 = vmatpush3.bf16.msra.mxu1 %v1443_v50 }
  0xf0   : > { %v506_v9 = vadd.f32 %v1291_v7, %v1673_v59  ;;  %v500_v10 = vpop.f32.mrb[5].mxu0  ;;  %1460 = vmatprep.subr.bf16.mxu1 %v1447_v52 }
  0xf1   : > { %v501_v11 = vadd.f32 %v1673_v59, %v500_v10  ;;  %1342 = vmatprep.mubr.f32.mxu1 %v561_v6 }
  0xf2   : > { %v564_v12 = vmax.f32 %v506_v9, 0.0  ;;  %1343 = vmatmul.mubr.f32.gmra.mrb[2].mxu1 %v562_v8 }
  0xf3   : > { %v563_v13 = vmax.f32 %v501_v11, 0.0  ;;  %v1294_v14 = vpop.f32.mrb[6].mxu0  ;;  %1464 = vmatpush3.bf16.msra.mxu1 %v1447_v52 }
  0xf4   : > { %v516_v15 = vadd.f32 %v1294_v14, %v1673_v59  ;;  %v510_v16 = vpop.f32.mrb[7].mxu0  ;;  %1461 = vmatprep.subr.bf16.mxu1 %v1451_v55 }
  0xf5   : > { %v511_v17 = vadd.f32 %v1673_v59, %v510_v16  ;;  %1345 = vmatprep.mubr.f32.mxu1 %v563_v13 }
  0xf6   : > { %v566_v18 = vmax.f32 %v516_v15, 0.0  ;;  %1346 = vmatmul.mubr.f32.gmra.mrb[4].mxu1 %v564_v12 }
  0xf7   : > { %v565_v19 = vmax.f32 %v511_v17, 0.0  ;;  %v1297_v20 = vpop.f32.mrb[8].mxu0  ;;  %1465 = vmatpush3.bf16.msra.mxu1 %v1451_v55 }
  0xf8   : > { %v526_v21 = vadd.f32 %v1297_v20, %v1673_v59  ;;  %v520_v22 = vpop.f32.mrb[9].mxu0  ;;  %1462 = vmatprep.subr.bf16.mxu1 %v1455_v58 }
  0xf9   : > { %v521_v23 = vadd.f32 %v1673_v59, %v520_v22  ;;  %1348 = vmatprep.mubr.f32.mxu1 %v565_v19 }
  0xfa   : > { %v568_v24 = vmax.f32 %v526_v21, 0.0  ;;  %1349 = vmatmul.mubr.f32.gmra.mrb[6].mxu1 %v566_v18 }
  0xfb   : > { %v567_v25 = vmax.f32 %v521_v23, 0.0  ;;  %v1300_v26 = vpop.f32.mrb[10].mxu0  ;;  %1466 = vmatpush3.bf16.msra.mxu1 %v1455_v58 }
  0xfc   : > { %v536_v27 = vadd.f32 %v1300_v26, %v1673_v59  ;;  %v530_v28 = vpop.f32.mrb[11].mxu0 }
  0xfd   : > { %v531_v29 = vadd.f32 %v1673_v59, %v530_v28  ;;  %1351 = vmatprep.mubr.f32.mxu1 %v567_v25 }
  0xfe   : > { %v570_v30 = vmax.f32 %v536_v27, 0.0  ;;  %1352 = vmatmul.mubr.f32.gmra.mrb[8].mxu1 %v568_v24 }
  0xff   : > { %v569_v31 = vmax.f32 %v531_v29, 0.0  ;;  %v1303_v32 = vpop.f32.mrb[12].mxu0  ;;  %v1713_v29 = vld [vmem:[%s1816_s6] ss:$0 sm:$0xff] }
 0x100   : > { %v546_v33 = vadd.f32 %v1303_v32, %v1673_v59  ;;  %v540_v34 = vpop.f32.mrb[13].mxu0 }
 0x101   : > { %v541_v35 = vadd.f32 %v1673_v59, %v540_v34  ;;  %1354 = vmatprep.mubr.f32.mxu1 %v569_v31  ;;  %v1720_v34 = vld [vmem:[%s1817_s7] ss:$0 sm:$0xff] }
 0x102   : > { %v572_v36 = vmax.f32 %v546_v33, 0.0  ;;  %1355 = vmatmul.mubr.f32.gmra.mrb[10].mxu1 %v570_v30 }
 0x103   : > { %v571_v37 = vmax.f32 %v541_v35, 0.0  ;;  %v1306_v38 = vpop.f32.mrb[14].mxu0 }
 0x104   : > { %v556_v39 = vadd.f32 %v1306_v38, %v1673_v59  ;;  %v550_v40 = vpop.f32.mrb[15].mxu0 }
 0x105   : > { %v551_v41 = vadd.f32 %v1673_v59, %v550_v40  ;;  %1357 = vmatprep.mubr.f32.mxu1 %v571_v37 }
 0x106   : > { %v574_v42 = vmax.f32 %v556_v39, 0.0  ;;  %1358 = vmatmul.mubr.f32.gmra.mrb[12].mxu1 %v572_v36 }
 0x107   : > { %v573_v43 = vmax.f32 %v551_v41, 0.0 }
 0x109   : > { %1360 = vmatprep.mubr.f32.mxu1 %v573_v43 }
 0x10a   : > { %1361 = vmatmul.mubr.f32.gmra.mrb[14].mxu1 %v574_v42 }
 0x1c1   : > { %v1341_v45 = vpop.f32.mrb[0].mxu1 }
 0x1c2   : > { %v670_v46 = vadd.f32 %v1341_v45, %v1177_v44  ;;  %v664_v47 = vpop.f32.mrb[1].mxu1 }
 0x1c3   : > { %v665_v48 = vadd.f32 %v1177_v44, %v664_v47 }
 0x1c4   : > { %v744_v51 = vmax.f32 %v670_v46, 0.0 }
 0x1c5   : > { %v743_v49 = vmax.f32 %v665_v48, 0.0  ;;  %v1344_v50 = vpop.f32.mrb[2].mxu1 }
 0x1c6   : > { %v680_v52 = vadd.f32 %v1344_v50, %v1177_v44  ;;  %v674_v53 = vpop.f32.mrb[3].mxu1 }
 0x1c7   : > { %v675_v54 = vadd.f32 %v1177_v44, %v674_v53  ;;  %1379 = vmatprep.mubr.msk.f32.mxu0 %vm774_vm1, %v743_v49 }
 0x1c8   : > { %1380 = vmatmul.mubr.msk.f32.vlgmr.msra.gmra.mrb[16].mxu0 %vm774_vm1, %v744_v51  ;;  %v746_v57 = vmax.f32 %v680_v52, 0.0 }
 0x1c9   : > { %v745_v55 = vmax.f32 %v675_v54, 0.0  ;;  %v1347_v56 = vpop.f32.mrb[4].mxu1 }
 0x1ca   : > { %v690_v58 = vadd.f32 %v1347_v56, %v1177_v44  ;;  %v684_v59 = vpop.f32.mrb[5].mxu1 }
 0x1cb   : > { %v685_v60 = vadd.f32 %v1177_v44, %v684_v59  ;;  %1382 = vmatprep.mubr.msk.f32.mxu0 %vm774_vm1, %v745_v55 }
 0x1cc   : > { %v748_v61 = vmax.f32 %v690_v58, 0.0  ;;  %1383 = vmatmul.mubr.msk.f32.gmra.mrb[18].mxu0 %vm774_vm1, %v746_v57 }
 0x1cd   : > { %v747_v62 = vmax.f32 %v685_v60, 0.0  ;;  %v1350_v63 = vpop.f32.mrb[6].mxu1 }
 0x1ce   : > { %v700_v0 = vadd.f32 %v1350_v63, %v1177_v44  ;;  %v694_v1 = vpop.f32.mrb[7].mxu1 }
 0x1cf   : > { %v695_v2 = vadd.f32 %v1177_v44, %v694_v1  ;;  %1385 = vmatprep.mubr.msk.f32.mxu0 %vm774_vm1, %v747_v62 }
 0x1d0   : > { %v750_v3 = vmax.f32 %v700_v0, 0.0  ;;  %1386 = vmatmul.mubr.msk.f32.gmra.mrb[20].mxu0 %vm774_vm1, %v748_v61 }
 0x1d1   : > { %v749_v4 = vmax.f32 %v695_v2, 0.0  ;;  %v1353_v5 = vpop.f32.mrb[8].mxu1 }
 0x1d2   : > { %v710_v6 = vadd.f32 %v1353_v5, %v1177_v44  ;;  %v704_v7 = vpop.f32.mrb[9].mxu1 }
 0x1d3   : > { %v705_v8 = vadd.f32 %v1177_v44, %v704_v7  ;;  %1388 = vmatprep.mubr.msk.f32.mxu0 %vm774_vm1, %v749_v4 }
 0x1d4   : > { %v752_v9 = vmax.f32 %v710_v6, 0.0  ;;  %1389 = vmatmul.mubr.msk.f32.gmra.mrb[22].mxu0 %vm774_vm1, %v750_v3 }
 0x1d5   : > { %v751_v10 = vmax.f32 %v705_v8, 0.0  ;;  %v1356_v11 = vpop.f32.mrb[10].mxu1 }
 0x1d6   : > { %v720_v12 = vadd.f32 %v1356_v11, %v1177_v44  ;;  %v714_v13 = vpop.f32.mrb[11].mxu1 }
 0x1d7   : > { %v715_v14 = vadd.f32 %v1177_v44, %v714_v13  ;;  %1391 = vmatprep.mubr.msk.f32.mxu0 %vm774_vm1, %v751_v10 }
 0x1d8   : > { %v754_v15 = vmax.f32 %v720_v12, 0.0  ;;  %1392 = vmatmul.mubr.msk.f32.gmra.mrb[24].mxu0 %vm774_vm1, %v752_v9 }
 0x1d9   : > { %v753_v16 = vmax.f32 %v715_v14, 0.0  ;;  %v1359_v17 = vpop.f32.mrb[12].mxu1 }
 0x1da   : > { %v730_v18 = vadd.f32 %v1359_v17, %v1177_v44  ;;  %v724_v19 = vpop.f32.mrb[13].mxu1 }
 0x1db   : > { %v725_v20 = vadd.f32 %v1177_v44, %v724_v19  ;;  %1394 = vmatprep.mubr.msk.f32.mxu0 %vm774_vm1, %v753_v16 }
 0x1dc   : > { %v756_v21 = vmax.f32 %v730_v18, 0.0  ;;  %1395 = vmatmul.mubr.msk.f32.gmra.mrb[26].mxu0 %vm774_vm1, %v754_v15 }
 0x1dd   : > { %v755_v22 = vmax.f32 %v725_v20, 0.0  ;;  %v1362_v23 = vpop.f32.mrb[14].mxu1 }
 0x1de   : > { %v740_v24 = vadd.f32 %v1362_v23, %v1177_v44  ;;  %v734_v25 = vpop.f32.mrb[15].mxu1 }
 0x1df   : > { %v735_v26 = vadd.f32 %v1177_v44, %v734_v25  ;;  %1397 = vmatprep.mubr.msk.f32.mxu0 %vm774_vm1, %v755_v22 }
 0x1e0   : > { %v758_v27 = vmax.f32 %v740_v24, 0.0  ;;  %1398 = vmatmul.mubr.msk.f32.gmra.mrb[28].mxu0 %vm774_vm1, %v756_v21 }
 0x1e1   : > { %v757_v28 = vmax.f32 %v735_v26, 0.0 }
 0x1e3   : > { %1400 = vmatprep.mubr.msk.f32.mxu1 %vm774_vm1, %v757_v28 }
 0x1e4   : > { %1401 = vmatmul.mubr.msk.f32.vlgmr.msra.gmra.mrb[16].mxu1 %vm774_vm1, %v758_v27 }
 0x29b   : > { %v1381_v30 = vpop.f32.mrb[16].mxu0 }
 0x29c   : > { %v895_v31 = vadd.f32 %v1381_v30, %v1713_v29  ;;  %v889_v32 = vpop.f32.mrb[17].mxu0 }
 0x29d   : > { %v890_v33 = vadd.f32 %v1713_v29, %v889_v32 }
 0x29e   : > { %v969_v35 = vmax.f32 %v895_v31, 0.0 }
 0x29f   : > { %v968_v36 = vmax.f32 %v890_v33, 0.0  ;;  %v1384_v37 = vpop.f32.mrb[18].mxu0 }
 0x2a0   : > { %v905_v38 = vadd.f32 %v1384_v37, %v1713_v29  ;;  %v899_v39 = vpop.f32.mrb[19].mxu0  ;;  %v992_v40 = vmul.f32 %v1720_v34, %v969_v35 }
 0x2a1   : > { %v900_v41 = vadd.f32 %v1713_v29, %v899_v39  ;;  %v991_v44 = vmul.f32 %v1720_v34, %v968_v36 }
 0x2a2   : > { %v971_v42 = vmax.f32 %v905_v38, 0.0  ;;  %v1010_v43 = vsel %vm365_vm0, %v992_v40, 0.0 }
 0x2a3   : > { %v970_v45 = vmax.f32 %v900_v41, 0.0  ;;  %1011 = vadd.xlane.f32.xlu0 %v1010_v43  ;;  %v1387_v46 = vpop.f32.mrb[20].mxu0  ;;  %v1007_v53 = vsel %vm365_vm0, %v991_v44, 0.0 }
 0x2a4   : > { %v915_v47 = vadd.f32 %v1387_v46, %v1713_v29  ;;  %v909_v48 = vpop.f32.mrb[21].mxu0  ;;  %v994_v49 = vmul.f32 %v1720_v34, %v971_v42 }
 0x2a5   : > { %v910_v50 = vadd.f32 %v1713_v29, %v909_v48  ;;  %v993_v54 = vmul.f32 %v1720_v34, %v970_v45  ;;  %v1196_v48 = vld [vmem:[#allocation2] ss:$0 sm:$0xff] }
 0x2a6   : > { %v973_v51 = vmax.f32 %v915_v47, 0.0  ;;  %v1016_v52 = vsel %vm365_vm0, %v994_v49, 0.0 }
 0x2a7   : > { %v972_v55 = vmax.f32 %v910_v50, 0.0  ;;  %1017 = vadd.xlane.f32.xlu1 %v1016_v52  ;;  %v1390_v56 = vpop.f32.mrb[22].mxu0  ;;  %1008 = vadd.xlane.f32.xlu0 %v1007_v53  ;;  %v1013_v62 = vsel %vm365_vm0, %v993_v54, 0.0 }
 0x2a8   : > { %v925_v57 = vadd.f32 %v1390_v56, %v1713_v29  ;;  %v919_v58 = vpop.f32.mrb[23].mxu0  ;;  %v996_v63 = vmul.f32 %v1720_v34, %v973_v51 }
 0x2a9   : > { %v920_v59 = vadd.f32 %v1713_v29, %v919_v58  ;;  %v995_v60 = vmul.f32 %v1720_v34, %v972_v55 }
 0x2aa   : > { %v975_v61 = vmax.f32 %v925_v57, 0.0  ;;  %v1022_v8 = vsel %vm365_vm0, %v996_v63, 0.0 }
 0x2ab   : > { %v974_v0 = vmax.f32 %v920_v59, 0.0  ;;  %v1393_v1 = vpop.f32.mrb[24].mxu0  ;;  %1014 = vadd.xlane.f32.xlu1 %v1013_v62  ;;  %v1019_v2 = vsel %vm365_vm0, %v995_v60, 0.0 }
 0x2ac   : > { %v935_v3 = vadd.f32 %v1393_v1, %v1713_v29  ;;  %v929_v4 = vpop.f32.mrb[25].mxu0  ;;  %1020 = vadd.xlane.f32.xlu0 %v1019_v2  ;;  %v998_v9 = vmul.f32 %v1720_v34, %v975_v61 }
 0x2ad   : > { %v930_v5 = vadd.f32 %v1713_v29, %v929_v4  ;;  %v997_v6 = vmul.f32 %v1720_v34, %v974_v0 }
 0x2ae   : > { %v977_v7 = vmax.f32 %v935_v3, 0.0  ;;  %v1028_v18 = vsel %vm365_vm0, %v998_v9, 0.0 }
 0x2af   : > { %v976_v10 = vmax.f32 %v930_v5, 0.0  ;;  %v1396_v11 = vpop.f32.mrb[26].mxu0  ;;  %1023 = vadd.xlane.f32.xlu1 %v1022_v8  ;;  %v1025_v12 = vsel %vm365_vm0, %v997_v6, 0.0 }
 0x2b0   : > { %v945_v13 = vadd.f32 %v1396_v11, %v1713_v29  ;;  %v939_v14 = vpop.f32.mrb[27].mxu0  ;;  %1026 = vadd.xlane.f32.xlu0 %v1025_v12  ;;  %v1000_v19 = vmul.f32 %v1720_v34, %v977_v7 }
 0x2b1   : > { %v940_v15 = vadd.f32 %v1713_v29, %v939_v14  ;;  %v999_v16 = vmul.f32 %v1720_v34, %v976_v10 }
 0x2b2   : > { %v979_v17 = vmax.f32 %v945_v13, 0.0  ;;  %v1034_v28 = vsel %vm365_vm0, %v1000_v19, 0.0 }
 0x2b3   : > { %v978_v20 = vmax.f32 %v940_v15, 0.0  ;;  %v1399_v21 = vpop.f32.mrb[28].mxu0  ;;  %1029 = vadd.xlane.f32.xlu1 %v1028_v18  ;;  %v1031_v22 = vsel %vm365_vm0, %v999_v16, 0.0 }
 0x2b4   : > { %v955_v23 = vadd.f32 %v1399_v21, %v1713_v29  ;;  %v949_v24 = vpop.f32.mrb[29].mxu0  ;;  %1032 = vadd.xlane.f32.xlu0 %v1031_v22  ;;  %v1002_v30 = vmul.f32 %v1720_v34, %v979_v17 }
 0x2b5   : > { %v950_v25 = vadd.f32 %v1713_v29, %v949_v24  ;;  %v1001_v26 = vmul.f32 %v1720_v34, %v978_v20 }
 0x2b6   : > { %v981_v27 = vmax.f32 %v955_v23, 0.0  ;;  %v1040_v40 = vsel %vm365_vm0, %v1002_v30, 0.0 }
 0x2b7   : > { %v980_v31 = vmax.f32 %v950_v25, 0.0  ;;  %v1402_v32 = vpop.f32.mrb[16].mxu1  ;;  %1035 = vadd.xlane.f32.xlu1 %v1034_v28  ;;  %v1037_v33 = vsel %vm365_vm0, %v1001_v26, 0.0 }
 0x2b8   : > { %v965_v35 = vadd.f32 %v1402_v32, %v1713_v29  ;;  %v959_v36 = vpop.f32.mrb[17].mxu1  ;;  %1038 = vadd.xlane.f32.xlu0 %v1037_v33  ;;  %v1004_v41 = vmul.f32 %v1720_v34, %v981_v27 }
 0x2b9   : > { %v960_v37 = vadd.f32 %v1713_v29, %v959_v36  ;;  %v1003_v38 = vmul.f32 %v1720_v34, %v980_v31 }
 0x2ba   : > { %v983_v39 = vmax.f32 %v965_v35, 0.0  ;;  %v1046_v45 = vsel %vm365_vm0, %v1004_v41, 0.0 }
 0x2bb   : > { %v982_v42 = vmax.f32 %v960_v37, 0.0  ;;  %1041 = vadd.xlane.f32.xlu1 %v1040_v40  ;;  %v1043_v43 = vsel %vm365_vm0, %v1003_v38, 0.0 }
 0x2bc   : > { %1044 = vadd.xlane.f32.xlu0 %v1043_v43  ;;  %v1006_v46 = vmul.f32 %v1720_v34, %v983_v39 }
 0x2bd   : > { %v1005_v44 = vmul.f32 %v1720_v34, %v982_v42 }
 0x2be   : > { %v1052_v47 = vsel %vm365_vm0, %v1006_v46, 0.0 }
 0x2bf   : > { %1047 = vadd.xlane.f32.xlu1 %v1046_v45  ;;  %v1049_v29 = vsel %vm365_vm0, %v1005_v44, 0.0 }
 0x2c0   : > { %1050 = vadd.xlane.f32.xlu0 %v1049_v29 }
 0x2c3   : > { %1053 = vadd.xlane.f32.xlu1 %v1052_v47 }
 0x330   : > { %v1012_v34 = vpop.xlane.xlu0 %1011 }
 0x331   : > { %v1063_v49 = vadd.f32 %v1196_v48, %v1012_v34 }
 0x333   : > { %1080 = vst.msk [vmem:[%s1773_s25 + $0x8] sm:$0xff] %vm1078_vm2, %v1063_v49 }
 0x334   : > { %v1018_v50 = vpop.xlane.xlu1 %1017  ;;  %v1009_v51 = vpop.xlane.xlu0 %1008 }
 0x335   : > { %v1065_v52 = vadd.f32 %v1196_v48, %v1018_v50  ;;  %v1062_v53 = vadd.f32 %v1196_v48, %v1009_v51 }
 0x337   : > { %1082 = vst.msk [vmem:[%s1773_s25 + $0x18] sm:$0xff] %vm1078_vm2, %v1065_v52  ;;  %1079 = vst.msk [vmem:[%s1773_s25] sm:$0xff] %vm1078_vm2, %v1062_v53 }
 0x338   : > { %v1015_v54 = vpop.xlane.xlu1 %1014 }
 0x339   : > { %v1064_v55 = vadd.f32 %v1196_v48, %v1015_v54  ;;  %v1021_v56 = vpop.xlane.xlu0 %1020 }
 0x33a   : > { %v1066_v57 = vadd.f32 %v1196_v48, %v1021_v56 }
 0x33b   : > { %1081 = vst.msk [vmem:[%s1773_s25 + $0x10] sm:$0xff] %vm1078_vm2, %v1064_v55 }
 0x33c   : > { %1083 = vst.msk [vmem:[%s1773_s25 + $0x20] sm:$0xff] %vm1078_vm2, %v1066_v57  ;;  %v1024_v58 = vpop.xlane.xlu1 %1023 }
 0x33d   : > { %v1067_v59 = vadd.f32 %v1196_v48, %v1024_v58  ;;  %v1027_v60 = vpop.xlane.xlu0 %1026 }
 0x33e   : > { %v1068_v61 = vadd.f32 %v1196_v48, %v1027_v60 }
 0x33f   : > { %1084 = vst.msk [vmem:[%s1773_s25 + $0x28] sm:$0xff] %vm1078_vm2, %v1067_v59 }
 0x340   : > { %1085 = vst.msk [vmem:[%s1773_s25 + $0x30] sm:$0xff] %vm1078_vm2, %v1068_v61  ;;  %v1030_v62 = vpop.xlane.xlu1 %1029 }
 0x341   : > { %v1069_v63 = vadd.f32 %v1196_v48, %v1030_v62  ;;  %v1033_v0 = vpop.xlane.xlu0 %1032 }
 0x342   : > { %v1070_v1 = vadd.f32 %v1196_v48, %v1033_v0 }
 0x343   : > { %1086 = vst.msk [vmem:[%s1773_s25 + $0x38] sm:$0xff] %vm1078_vm2, %v1069_v63 }
 0x344   : > { %1087 = vst.msk [vmem:[%s1773_s25 + $0x40] sm:$0xff] %vm1078_vm2, %v1070_v1  ;;  %v1036_v2 = vpop.xlane.xlu1 %1035 }
 0x345   : > { %v1071_v3 = vadd.f32 %v1196_v48, %v1036_v2  ;;  %v1039_v4 = vpop.xlane.xlu0 %1038 }
 0x346   : > { %v1072_v5 = vadd.f32 %v1196_v48, %v1039_v4 }
 0x347   : > { %1088 = vst.msk [vmem:[%s1773_s25 + $0x48] sm:$0xff] %vm1078_vm2, %v1071_v3 }
 0x348   : > { %1089 = vst.msk [vmem:[%s1773_s25 + $0x50] sm:$0xff] %vm1078_vm2, %v1072_v5  ;;  %v1042_v6 = vpop.xlane.xlu1 %1041 }
 0x349   : > { %v1073_v7 = vadd.f32 %v1196_v48, %v1042_v6  ;;  %v1045_v8 = vpop.xlane.xlu0 %1044 }
 0x34a   : > { %v1074_v9 = vadd.f32 %v1196_v48, %v1045_v8 }
 0x34b   : > { %1090 = vst.msk [vmem:[%s1773_s25 + $0x58] sm:$0xff] %vm1078_vm2, %v1073_v7 }
 0x34c   : > { %1091 = vst.msk [vmem:[%s1773_s25 + $0x60] sm:$0xff] %vm1078_vm2, %v1074_v9  ;;  %v1048_v10 = vpop.xlane.xlu1 %1047 }
 0x34d   : > { %v1075_v11 = vadd.f32 %v1196_v48, %v1048_v10  ;;  %v1051_v12 = vpop.xlane.xlu0 %1050 }
 0x34e   : > { %v1076_v13 = vadd.f32 %v1196_v48, %v1051_v12 }
 0x34f   : > { %1092 = vst.msk [vmem:[%s1773_s25 + $0x68] sm:$0xff] %vm1078_vm2, %v1075_v11 }
 0x350   : > { %1093 = vst.msk [vmem:[%s1773_s25 + $0x70] sm:$0xff] %vm1078_vm2, %v1076_v13  ;;  %v1054_v14 = vpop.xlane.xlu1 %1053 }
 0x351   : > { %v1077_v15 = vadd.f32 %v1196_v48, %v1054_v14 }
 0x353   : > { %1094 = vst.msk [vmem:[%s1773_s25 + $0x78] sm:$0xff] %vm1078_vm2, %v1077_v15 }
 0x354 PF: > { %s21_s11 = sadd.s32 1, %s1481_s11  }
 0x355   : > { %p18_p4 = scmp.ge.s32.totalorder %s21_s11, 4  }
 0x357   :  { %20 = sbr.rel (!%p18_p4) target bundleno = 3 (0x3), region = 86 }

</bundles_post_ra>
